<compile_context>
chip_gen: v7x
topology: tpu7x:2x2x1
jax: 0.10.0
libtpu: 0.0.40
codegen_flags: <defaults>
</compile_context>

<pallas_src>
import math

import jax
import jax.numpy as jnp
from jax.experimental import pallas as pl
from jax.experimental.pallas import tpu as pltpu


def _attention_kernel(x_ref, w_ref, weighted_ref, attn_ref):
    # x_ref:        (bb, T, H)  input block, native dtype
    # w_ref:        (1, H)      attention weight row (same block every grid step)
    # weighted_ref: (bb, T, H)
    # attn_ref:     (bb, T)
    x = x_ref[...]                                     # read once, native dtype
    w = w_ref[...].astype(jnp.float32)                 # (1, H)

    # scores[b, t] = sum_h x[b, t, h] * w[h]
    # VPU multiply + lane reduce; avoids any O(T^2*H) helper operand entirely.
    scores = jnp.sum(x.astype(jnp.float32) * w[None, :, :], axis=-1)   # (bb, T)

    # relu + numerically stable softmax along the sequence axis (all f32).
    s = jnp.maximum(scores, 0.0)
    m = jnp.max(s, axis=-1, keepdims=True)
    e = jnp.exp(s - m)
    denom = jnp.sum(e, axis=-1, keepdims=True)
    # torch's extra `masked / masked.sum()` re-normalization is a mathematical
    # no-op -> one exact reciprocal reproduces it to ~1 ulp.
    attn = e * pl.reciprocal(denom, approx=False)      # (bb, T), f32

    # Broadcast attn across the H lanes of each time step with a plain VPU
    # multiply; attn stays f32 until the final stores.
    weighted = x.astype(jnp.float32) * attn[:, :, None]        # (bb, T, H), f32
    weighted_ref[...] = weighted.astype(weighted_ref.dtype)
    attn_ref[...] = attn.astype(attn_ref.dtype)


def _round_up(x, m):
    return ((x + m - 1) // m) * m


def _vmem_and_tile_budget():
    """Returns (vmem_limit_bytes, target padded-tile bytes for the x block)."""
    phys = 64 * 1024 * 1024            # assume the smallest-VMEM generation (v7x)
    try:                               # trace-time HW query; fall back if unavailable
        phys = int(pltpu.get_tpu_info().vmem_capacity_bytes)
    except Exception:
        pass
    vmem_limit = min((phys * 3) // 4, 64 * 1024 * 1024)   # 48 MiB v7x, 64 MiB v5e/v6e
    # Live per step: 2x double-buffered x + 2x double-buffered weighted (same padded
    # size) + a few tile-sized f32 temporaries inside the body  ->  budget ~1/8.
    tile_target = max(1 << 20, vmem_limit // 8)
    return int(vmem_limit), int(tile_target)


def _pick_batch_block(batch, padded_row_bytes, target_bytes):
    """Batch rows of x per grid step.

    Invariants:
      * bb is a multiple of 8 or exactly `batch` (bb is the second-to-last dim of
        the (bb, T) attention output block) -- no sublane-alignment edge case.
      * ~target_bytes of padded x per tile (amortizes ~0.35us per-step overhead,
        lets double-buffering hide HBM latency).
      * When there is more than one step, prefer an even step count so the two
        TensorCores of a v7x chip get balanced work; no artificial megacore cap.
    """
    bb = max(1, int(target_bytes) // max(int(padded_row_bytes), 1))
    if bb >= batch:
        return int(batch)
    bb = max(8, (bb // 8) * 8)
    if bb >= batch:
        return int(batch)
    steps = pl.cdiv(batch, bb)
    if steps % 2 == 1:                                   # odd grid -> try next even count
        bb_even = _round_up(pl.cdiv(batch, steps + 1), 8)
        if 8 <= bb_even <= bb and pl.cdiv(batch, bb_even) % 2 == 0:
            bb = bb_even
    return int(bb)


def attention_forward(inputs, att_weights, *, block_b=None):
    """inputs: (B, T, H); att_weights: (1, H). Returns (weighted (B,T,H), attn (B,T))."""
    B, T, H = inputs.shape
    assert att_weights.shape == (1, H)
    dtype = inputs.dtype
    itemsize = jnp.dtype(dtype).itemsize

    # Padded VMEM footprint of one batch row of the x block: the minor dim pads to a
    # multiple of 128 lanes and the second-minor to a multiple of 8 sublanes, so
    # H < 128 costs lane padding that the tile budget must include.
    padded_row_bytes = _round_up(T, 8) * _round_up(H, 128) * itemsize

    vmem_limit, tile_target = _vmem_and_tile_budget()
    bb = block_b if block_b is not None else _pick_batch_block(B, padded_row_bytes, tile_target)
    assert bb == B or bb % 8 == 0, "batch block must be sublane-aligned or full"
    grid = (pl.cdiv(B, bb),)

    out_shapes = (
        jax.ShapeDtypeStruct((B, T, H), dtype),
        jax.ShapeDtypeStruct((B, T), dtype),
    )
    in_specs = [
        pl.BlockSpec((bb, T, H), lambda b: (b, 0, 0)),   # x block
        pl.BlockSpec((1, H), lambda b: (0, 0)),          # weight row (constant, tiny)
    ]
    out_specs = (
        pl.BlockSpec((bb, T, H), lambda b: (b, 0, 0)),   # weighted
        # attentions are part of the module's return; T < 128 means a lane-masked
        # store, but it is only ~1/H of the traffic.
        pl.BlockSpec((bb, T), lambda b: (b, 0)),
    )

    cost = pl.CostEstimate(
        flops=int(3 * B * T * H + 5 * B * T),            # score mul+add, softmax, final scale
        transcendentals=int(B * T),                      # exp
        bytes_accessed=int((2 * B * T * H + B * T) * itemsize + H * itemsize),
    )

    weighted, attn = pl.pallas_call(
        _attention_kernel,
        out_shape=out_shapes,
        grid=grid,
        in_specs=in_specs,
        out_specs=out_specs,
        compiler_params=pltpu.CompilerParams(
            dimension_semantics=("parallel",),
            vmem_limit_bytes=int(vmem_limit),
        ),
        cost_estimate=cost,
    )(inputs, att_weights.astype(dtype))

    return weighted, attn


def init_att_weights(key, hidden_size, dtype=jnp.float32):
    # torch: nn.init.uniform_(weight, -stdv, stdv) with stdv = 1/sqrt(hidden_size)
    stdv = 1.0 / math.sqrt(hidden_size)
    return jax.random.uniform(
        key, (1, hidden_size), dtype=dtype, minval=-stdv, maxval=stdv
    )


def reference_forward(inputs, att_weights):
    # Pure-JAX reference mirroring the torch forward (batch_first layout).
    scores = jnp.einsum("bth,h->bt", inputs, att_weights[0])
    masked = jax.nn.softmax(jax.nn.relu(scores), axis=-1)
    sums = masked.sum(-1, keepdims=True)
    attn = masked / sums
    weighted = inputs * attn[:, :, None]
    return weighted, attn


if __name__ == "__main__":
    key = jax.random.PRNGKey(0)
    k_x, k_w, k_x2 = jax.random.split(key, 3)

    # Small demo shapes consistent with the module: batch=2, seq=8, hidden=32.
    B, T, H = 2, 8, 32
    x = jax.random.normal(k_x, (B, T, H), dtype=jnp.float32)
    w = init_att_weights(k_w, H)

    weighted, attn = attention_forward(x, w)
    weighted = jax.block_until_ready(weighted)
    attn = jax.block_until_ready(attn)

    ref_weighted, ref_attn = reference_forward(x, w)
    assert jnp.allclose(weighted, ref_weighted, atol=1e-4, rtol=1e-4)
    assert jnp.allclose(attn, ref_attn, atol=1e-4, rtol=1e-4)

    # Multi-step grid with a partial last batch block (12 = 8 + 4): exercises the
    # sublane-aligned bb path and the masked handling of the final block
    # (review correctness concern about non-divisible B).
    B2 = 12
    x2 = jax.random.normal(k_x2, (B2, T, H), dtype=jnp.float32)
    weighted2, attn2 = attention_forward(x2, w, block_b=8)
    weighted2 = jax.block_until_ready(weighted2)
    attn2 = jax.block_until_ready(attn2)
    ref_w2, ref_a2 = reference_forward(x2, w)
    assert jnp.allclose(weighted2, ref_w2, atol=1e-4, rtol=1e-4)
    assert jnp.allclose(attn2, ref_a2, atol=1e-4, rtol=1e-4)

    print("KERNEL_OK")
</pallas_src>

<mosaic_0001>
module attributes {stable_mosaic.version = 11 : i64} {
  func.func @_attention_kernel(%arg0: i32, %arg1: memref<2x8x32xf32, #tpu.memory_space<vmem>>, %arg2: memref<1x32xf32, #tpu.memory_space<vmem>>, %arg3: memref<2x8x32xf32, #tpu.memory_space<vmem>>, %arg4: memref<2x8xf32, #tpu.memory_space<vmem>>) attributes {dimension_semantics = [#tpu.dimension_semantics<parallel>], iteration_bounds = array<i64: 1>, scalar_prefetch = 0 : i64, scratch_operands = 0 : i64, tpu.core_type = #tpu.core_type<tc>, window_params = [{transform_indices = @transform_0, window_bounds = array<i64: 2, 8, 32>}, {pipeline_mode = #tpu.pipeline_mode<synchronous>, transform_indices = @transform_1, window_bounds = array<i64: 1, 32>}, {transform_indices = @transform_2, window_bounds = array<i64: 2, 8, 32>}, {transform_indices = @transform_3, window_bounds = array<i64: 2, 8>}]} {
    %c0 = arith.constant 0 : index
    %c0_0 = arith.constant 0 : index
    %c0_1 = arith.constant 0 : index
    %0 = vector.load %arg1[%c0, %c0_0, %c0_1] : memref<2x8x32xf32, #tpu.memory_space<vmem>>, vector<2x8x32xf32>
    %c0_2 = arith.constant 0 : index
    %c0_3 = arith.constant 0 : index
    %1 = vector.load %arg2[%c0_2, %c0_3] : memref<1x32xf32, #tpu.memory_space<vmem>>, vector<1x32xf32>
    %2 = vector.shape_cast %1 : vector<1x32xf32> to vector<1x1x32xf32>
    %3 = vector.broadcast %2 : vector<1x1x32xf32> to vector<2x8x32xf32>
    %4 = arith.mulf %0, %3 : vector<2x8x32xf32>
    %cst = arith.constant dense<0.000000e+00> : vector<2x8xf32>
    %5 = vector.multi_reduction <add>, %4, %cst [2] : vector<2x8x32xf32> to vector<2x8xf32>
    %cst_4 = arith.constant 0.000000e+00 : f32
    %6 = vector.broadcast %cst_4 : f32 to vector<2x8xf32>
    %7 = arith.maximumf %5, %6 : vector<2x8xf32>
    %cst_5 = arith.constant dense<0xFF800000> : vector<2xf32>
    %8 = vector.multi_reduction <maximumf>, %7, %cst_5 [1] : vector<2x8xf32> to vector<2xf32>
    %9 = vector.shape_cast %8 : vector<2xf32> to vector<2x1xf32>
    %10 = vector.broadcast %9 : vector<2x1xf32> to vector<2x8xf32>
    %11 = arith.subf %7, %10 : vector<2x8xf32>
    %12 = math.exp %11 : vector<2x8xf32>
    %cst_6 = arith.constant dense<0.000000e+00> : vector<2xf32>
    %13 = vector.multi_reduction <add>, %12, %cst_6 [1] : vector<2x8xf32> to vector<2xf32>
    %14 = vector.shape_cast %13 : vector<2xf32> to vector<2x1xf32>
    %15 = tpu.reciprocal %14 : vector<2x1xf32> -> vector<2x1xf32>
    %16 = vector.broadcast %15 : vector<2x1xf32> to vector<2x8xf32>
    %17 = arith.mulf %12, %16 : vector<2x8xf32>
    %18 = vector.shape_cast %17 : vector<2x8xf32> to vector<2x8x1xf32>
    %19 = vector.broadcast %18 : vector<2x8x1xf32> to vector<2x8x32xf32>
    %20 = arith.mulf %0, %19 : vector<2x8x32xf32>
    %c0_7 = arith.constant 0 : index
    %c0_8 = arith.constant 0 : index
    %c0_9 = arith.constant 0 : index
    %21 = vector.load %arg3[%c0_7, %c0_8, %c0_9] : memref<2x8x32xf32, #tpu.memory_space<vmem>>, vector<2x8x32xf32>
    tpu.vector_store %arg3[%c0_7, %c0_8, %c0_9], %20 {strides = array<i32>} : memref<2x8x32xf32, #tpu.memory_space<vmem>>, vector<2x8x32xf32>,
    %c0_10 = arith.constant 0 : index
    %c0_11 = arith.constant 0 : index
    %22 = vector.load %arg4[%c0_10, %c0_11] : memref<2x8xf32, #tpu.memory_space<vmem>>, vector<2x8xf32>
    tpu.vector_store %arg4[%c0_10, %c0_11], %17 {strides = array<i32>} : memref<2x8xf32, #tpu.memory_space<vmem>>, vector<2x8xf32>,
    return
  }
  func.func @transform_0(%arg0: i32) -> (i32, i32, i32) {
    %c0_i32 = arith.constant 0 : i32
    %c0_i32_0 = arith.constant 0 : i32
    %c0_i32_1 = arith.constant 0 : i32
    return %arg0, %c0_i32, %c0_i32_0 : i32, i32, i32
  }
  func.func @transform_1(%arg0: i32) -> (i32, i32) {
    %c0_i32 = arith.constant 0 : i32
    %c0_i32_0 = arith.constant 0 : i32
    %c0_i32_1 = arith.constant 0 : i32
    return %c0_i32, %c0_i32_0 : i32, i32
  }
  func.func @transform_2(%arg0: i32) -> (i32, i32, i32) {
    %c0_i32 = arith.constant 0 : i32
    %c0_i32_0 = arith.constant 0 : i32
    %c0_i32_1 = arith.constant 0 : i32
    return %arg0, %c0_i32, %c0_i32_0 : i32, i32, i32
  }
  func.func @transform_3(%arg0: i32) -> (i32, i32) {
    %c0_i32 = arith.constant 0 : i32
    %c0_i32_0 = arith.constant 0 : i32
    return %arg0, %c0_i32 : i32, i32
  }
}

</mosaic_0001>

<bundles_post_ra>
// kernel: tpu_custom_call.1
= control target key start
LH: loop header
LB: loop body
LE: loop exit
PB: predicated region body
PF: predicated region fallthrough
CT: control target
= control target key end

     0   :  { %9 = vsyncpa [#allocation3], 0  ;;  %s355_s0 = inlined_call_operand.hbm [shape: f32[2,8,32], index: 0, kind: input, shape index: {}]   ;;  %s356_s1 = inlined_call_operand.vmem [shape: f32[1,32], index: 1, kind: input, shape index: {}]   ;;  %s357_s2 = inlined_call_operand.hbm [shape: f32[2,8,32], index: 2, kind: output, shape index: {0}]   ;;  %s358_s3 = inlined_call_operand.hbm [shape: f32[2,8], index: 3, kind: output, shape index: {1}]  }
   0x1   :  { %10 = vsyncpa [#allocation4], 0 }
   0x2   :  { %11 = vsyncpa [#allocation7], 0  ;;  %s263_s12 = smov [#allocation2]   ;;  %s191_s16 = scalar_lea.hbm %s355_s0, 256 }
   0x3   :  { %s17_s13 = sshll.u32 %s263_s12, 4  ;;  %p192_p0 = scmp.ne.s32.totalorder %s355_s0, %s191_s16  ;;  %s18_s13 = int_to_ptr.vmem [resolvable:$true] %s17_s13 }
   0x4   :  { %p195_p1 = scmp.lt.u32.totalorder %s191_s16, %s355_s0 }
   0x6   :  { %p197_p2 = pnand %p195_p1, %p192_p0 }
   0x8   :  { %200 = shalt.err (!%p197_p2)
}
   0x9   :  { %s201_s21 = scalar_lea.vmem %s18_s13, 256  ;;  %p206_p4 = scmp.lt.s32.totalorder %s18_s13, %s18_s13 }
   0xa   :  { %p202_p3 = scmp.ne.s32.totalorder %s18_s13, %s201_s21  ;;  %p207_p5 = scmp.lt.s32.totalorder %s201_s21, %s201_s21 }
   0xc   :  { %p208_p6 = por %p207_p5, %p206_p4 }
   0xe   :  { %p209_p7 = pnand %p208_p6, %p202_p3 }
  0x10   :  { %212 = shalt.err (!%p209_p7)
}
  0x11   :  { %s264_s22 = smov 128   ;;  %s265_s23 = smov 8  }
  0x12   :  { %23 = dma.hbm_to_vmem [thread:$0]  %s355_s0, 256, %s18_s13, [#allocation3], %s264_s22, %s264_s22, %s265_s23  }
  0x13   :  { %257 = dma.done.wait [#allocation3], 256  }
  0x14   :  { %258 = vsyncadd [#allocation3], 4294967040  ;;  %v29_v0 = vld [vmem:[#allocation2] sm:$0xff]  ;;  %vm40_vm0 = vcmask 261120   ;;  %v307_v2 = vld [vmem:[#allocation2 + $0x8] sm:$0xff]  ;;  %v51_v7 = vlaneseq  ;;  %vm61_vm1 = vcmask 1041409  }
  0x15   :  { %v176_v1 = vld [vmem:[%s356_s1] ss:$0 sm:$0xff]  ;;  %vm64_vm2 = vcmask 58368   ;;  %v266_v19 = vmov 0   ;;  %s267_s0 = smov [#allocation5]   ;;  %s268_s28 = smov [#allocation6]  }
  0x16   :  { %v38_v3 = vmul.f32 %v176_v1, %v29_v0  ;;  %v39_v4 = vmul.f32 %v176_v1, %v307_v2  ;;  %v52_v8 = vand.u32 127, %v51_v7  ;;  %v54_v9 = vshrl.u32 %v51_v7, 7  ;;  %184 = vset.pattern.permute.xlu0 %v266_v19  ;;  %183 = vset.pattern.permute.xlu1 %v266_v19  ;;  %s150_s1 = sshll.u32 %s267_s0, 4  ;;  %s163_s29 = sshll.u32 %s268_s28, 4  ;;  %s151_s1 = int_to_ptr.vmem [resolvable:$true] %s150_s1  ;;  %s318_s29 = int_to_ptr.vmem [resolvable:$true] %s163_s29 }
  0x17   :  { %s213_s30 = scalar_lea.vmem %s151_s1, 256  ;;  %p218_p9 = scmp.lt.s32.totalorder %s151_s1, %s151_s1 }
  0x18   :  { %v41_v5 = vsel %vm40_vm0, %v38_v3, 0.0  ;;  %v44_v6 = vsel %vm40_vm0, %v39_v4, 0.0  ;;  %v55_v11 = vsub.s32 %v52_v8, %v54_v9  ;;  %v71_v20 = vsub.s32 0, %v54_v9  ;;  %p214_p8 = scmp.ne.s32.totalorder %s151_s1, %s213_s30  ;;  %p219_p10 = scmp.lt.s32.totalorder %s213_s30, %s213_s30 }
  0x19   :  { %42 = vadd.xlane.f32.xlu0 %v41_v5  ;;  %v75_v21 = vsub.s32 1, %v54_v9 }
  0x1a   :  { %p220_p11 = por %p219_p10, %p218_p9 }
  0x1c   :  { %p221_p12 = pnand %p220_p11, %p214_p8 }
  0x1d   :  { %45 = vadd.xlane.f32.xlu0 %v44_v6 }
  0xa6   :  { %v43_v10 = vpop.xlane.xlu0 %42 }
  0xa7   :  { %v47_v12 = vmax.f32 %v43_v10, 0.0 }
  0xa9   :  { %v56_v15 = vrot.slane %v47_v12, %v55_v11 }
  0xaa   :  { %v46_v13 = vpop.xlane.xlu0 %45 }
  0xab   :  { %v48_v14 = vmax.f32 %v46_v13, 0.0 }
  0xad   :  { %v60_v16 = vrot.slane %v48_v14, %v55_v11 }
  0xaf   :  { %v62_v17 = vsel %vm61_vm1, %v60_v16, %v56_v15 }
  0xb0   :  { %v65_v18 = vsel %vm64_vm2, %v62_v17, -inf }
  0xb1   :  { %66 = vmax.xlane.f32.xlu1 %v65_v18 }
 0x13e   :  { %v67_v22 = vpop.xlane.xlu1 %66 }
 0x13f   :  { %v72_v23 = vrot.slane %v67_v22, %v71_v20  ;;  %v76_v24 = vrot.slane %v67_v22, %v75_v21 }
 0x141   :  { %v79_v25 = vsub.f32 %v47_v12, %v72_v23  ;;  %v80_v26 = vsub.f32 %v48_v14, %v76_v24 }
 0x143   :  { %v81_v27 = vmul.f32 1.442695, %v79_v25  ;;  %v83_v28 = vmul.f32 1.442695, %v80_v26 }
 0x145   :  { %185 = vpow2.f32 %v81_v27 }
 0x146   :  { %187 = vpow2.f32 %v83_v28 }
 0x14f   :  { %v186_v29 = vpop.eup %185 }
 0x150   :  { %v188_v30 = vpop.eup %187  ;;  %88 = vperm.xlu1 %183, %v186_v29  }
 0x151   :  { %91 = vperm.xlu0 %184, %v188_v30  }
 0x1cf   :  { %v89_v31 = vpop.permute.xlu1 %88 }
 0x1d0   :  { %v92_v32 = vpop.permute.xlu0 %91  ;;  %v96_v33 = vrot.slane %v89_v31, %v55_v11 }
 0x1d1   :  { %v100_v34 = vrot.slane %v92_v32, %v55_v11 }
 0x1d3   :  { %v101_v35 = vsel %vm61_vm1, %v100_v34, %v96_v33 }
 0x1d4   :  { %v103_v36 = vsel %vm64_vm2, %v101_v35, 0.0 }
 0x1d5   :  { %104 = vadd.xlane.f32.xlu1 %v103_v36 }
 0x262   :  { %v105_v37 = vpop.xlane.xlu1 %104 }
 0x263   :  { %189 = vrcp.f32 %v105_v37 }
 0x26d   :  { %v190_v38 = vpop.eup %189 }
 0x26e   :  { %v111_v39 = vrot.slane %v190_v38, %v71_v20  ;;  %v115_v41 = vrot.slane %v190_v38, %v75_v21 }
 0x270   :  { %v118_v40 = vmul.f32 %v186_v29, %v111_v39  ;;  %v119_v42 = vmul.f32 %v188_v30, %v115_v41 }
 0x272   :  { %122 = vperm.xlu0 %184, %v118_v40  }
 0x276   :  { %127 = vperm.xlu0 %184, %v119_v42  }
 0x2f1   :  { %v123_v43 = vpop.permute.xlu0 %122 }
 0x2f2   :  { %v130_v44 = vmul.f32 %v123_v43, %v29_v0  ;;  %v137_v46 = vrot.slane %v123_v43, %v55_v11 }
 0x2f4   :  { %132 = vst.msk [vmem:[#allocation5] sm:$0xff] %vm40_vm0, %v130_v44 }
 0x2f5   :  { %v128_v45 = vpop.permute.xlu0 %127 }
 0x2f6   :  { %v131_v47 = vmul.f32 %v128_v45, %v307_v2  ;;  %v141_v48 = vrot.slane %v128_v45, %v55_v11 }
 0x2f8   :  { %133 = vst.msk [vmem:[#allocation5 + $0x8] sm:$0xff] %vm40_vm0, %v131_v47  ;;  %v142_v49 = vsel %vm61_vm1, %v141_v48, %v137_v46 }
 0x2f9   :  { %224 = shalt.err (!%p221_p12)
}
 0x2fa   :  { %s225_s6 = scalar_lea.hbm %s357_s2, 256 }
 0x2fb   :  { %p226_p13 = scmp.ne.s32.totalorder %s357_s2, %s225_s6  ;;  %p229_p0 = scmp.lt.u32.totalorder %s225_s6, %s357_s2 }
 0x2fd   :  { %p231_p1 = pnand %p229_p0, %p226_p13 }
 0x2ff   :  { %234 = shalt.err (!%p231_p1)
}
 0x300   :  { %156 = dma.vmem_to_hbm [thread:$0]  %s151_s1, 256, %s357_s2, [#allocation4], %s264_s22, %s264_s22, %s265_s23   ;;  %144 = vst.msk [vmem:[#allocation6] sm:$0x3] %vm64_vm2, %v142_v49 }
 0x301   :  { %s235_s13 = scalar_lea.vmem %s318_s29, 32  ;;  %p240_p3 = scmp.lt.s32.totalorder %s318_s29, %s318_s29 }
 0x302   :  { %p236_p2 = scmp.ne.s32.totalorder %s318_s29, %s235_s13  ;;  %p241_p4 = scmp.lt.s32.totalorder %s235_s13, %s235_s13 }
 0x304   :  { %p242_p5 = por %p241_p4, %p240_p3 }
 0x306   :  { %p243_p6 = pnand %p242_p5, %p236_p2 }
 0x308   :  { %246 = shalt.err (!%p243_p6)
}
 0x309   :  { %s247_s16 = scalar_lea.hbm %s358_s3, 32 }
 0x30a   :  { %p248_p7 = scmp.ne.s32.totalorder %s358_s3, %s247_s16  ;;  %p251_p8 = scmp.lt.u32.totalorder %s247_s16, %s358_s3 }
 0x30c   :  { %p253_p9 = pnand %p251_p8, %p248_p7 }
 0x30e   :  { %256 = shalt.err (!%p253_p9)
}
 0x30f   :  { %166 = dma.vmem_to_hbm [thread:$0]  %s318_s29, 32, %s358_s3, [#allocation7]  }
 0x310   :  { %259 = dma.done.wait [#allocation4], 256  }
 0x311   :  { %260 = vsyncadd [#allocation4], 4294967040 }
 0x312   :  { %261 = dma.done.wait [#allocation7], 32  }
 0x313   :  { %262 = vsyncadd [#allocation7], 4294967264 }
 0x314   :  { %173 = vsyncpa [#allocation3], 1 }
 0x315   :  { %174 = vsyncpa [#allocation4], 1 }
 0x316   :  { %175 = vsyncpa [#allocation7], 1 }

</bundles_post_ra>
